<compile_context>
chip_gen: v7x
topology: tpu7x:2x2x1
jax: 0.10.0
libtpu: 0.0.40
codegen_flags: <defaults>
</compile_context>

<pallas_src>
import jax
import jax.numpy as jnp
from jax.experimental import pallas as pl
from jax.experimental.pallas import tpu as pltpu

_LANE = 128            # lane-dense last dim (full vreg width)
_SUBLANE = 8           # f32 sublane multiple
_TILE_ROWS_MAX = 2048  # 2048 x 128 f32 = 1 MiB per buffer
_TINY_ELEMS = 64 * 1024  # single-block fast path at or below this size


def _elementwise_kernel(x_ref, add_ref, sub_ref, mul_ref, div_ref, cmp_ref):
    x = x_ref[...]
    add_ref[...] = x + 2.0
    sub_ref[...] = x - 2.0
    mul_ref[...] = x * 2.0
    div_ref[...] = x * 0.5          # bit-exact for /2 in IEEE floats
    cmp_ref[...] = x > 1.0


def _round_up(v, m):
    return ((v + m - 1) // m) * m


def _out_shapes(rows, dtype):
    f = jax.ShapeDtypeStruct((rows, _LANE), dtype)
    b = jax.ShapeDtypeStruct((rows, _LANE), jnp.bool_)
    return (f, f, f, f, b)


def pt_module_forward(x):
    """Pallas implementation of PtModule.forward.

    Returns (x+2, x-2, x*2, x/2, x>1) with the comparison as bool,
    matching the PyTorch semantics exactly.
    """
    orig_shape = x.shape
    n = x.size
    dtype = x.dtype
    flat = x.reshape(-1)

    # ------------------------------------------------------------------
    # Tiny fast path: single VMEM block, no pipelined grid.
    # ------------------------------------------------------------------
    if n <= _TINY_ELEMS:
        n_pad = _round_up(n, _LANE)
        padded = n_pad != n
        if padded:
            flat = jnp.pad(flat, (0, n_pad - n))
        rows = n_pad // _LANE
        x2d = flat.reshape(rows, _LANE)

        outs = pl.pallas_call(
            _elementwise_kernel,
            out_shape=_out_shapes(rows, dtype),
        )(x2d)

        def restore(o):
            if padded:
                return o.reshape(-1)[:n].reshape(orig_shape)
            return o.reshape(orig_shape)

        return tuple(restore(o) for o in outs)

    # ------------------------------------------------------------------
    # Tiled path: lane-dense (rows, 128) slab, auto double-buffered grid.
    # Pad only to a (8, 128) multiple; Pallas masks the last partial block.
    # ------------------------------------------------------------------
    n_pad = _round_up(n, _SUBLANE * _LANE)
    padded = n_pad != n
    if padded:
        flat = jnp.pad(flat, (0, n_pad - n))
    rows = n_pad // _LANE                       # multiple of 8

    # Largest tile that fits, but keep >=2 grid steps so both v7x
    # TensorCores participate on medium inputs.
    tile_rows = min(_TILE_ROWS_MAX, _round_up(pl.cdiv(rows, 2), _SUBLANE))
    grid = (pl.cdiv(rows, tile_rows),)

    x2d = flat.reshape(rows, _LANE)
    spec = pl.BlockSpec((tile_rows, _LANE), lambda i: (i, 0))

    cost = pl.CostEstimate(
        flops=5 * n,                 # 4 arith + 1 compare per element
        transcendentals=0,
        bytes_accessed=21 * n,       # 4B read + 4x4B f32 writes + 1B bool write
    )

    outs = pl.pallas_call(
        _elementwise_kernel,
        out_shape=_out_shapes(rows, dtype),
        grid_spec=pltpu.PrefetchScalarGridSpec(
            num_scalar_prefetch=0,
            grid=grid,
            in_specs=[spec],
            out_specs=(spec,) * 5,
        ),
        compiler_params=pltpu.CompilerParams(
            dimension_semantics=("parallel",),
            vmem_limit_bytes=32 << 20,   # ~10.5 MiB live; fits v5e/v6e/v7x
        ),
        cost_estimate=cost,
    )(x2d)

    def restore(o):
        if padded:
            return o.reshape(-1)[:n].reshape(orig_shape)
        return o.reshape(orig_shape)

    return tuple(restore(o) for o in outs)


if __name__ == "__main__":
    key = jax.random.PRNGKey(0)
    x = jax.random.normal(key, (2, 4, 16, 16), dtype=jnp.float32)

    add, sub, mul, div, cmp = pt_module_forward(x)
    jax.block_until_ready((add, sub, mul, div, cmp))

    # Sanity checks against plain-JAX reference.
    assert add.shape == x.shape and add.dtype == x.dtype
    assert jnp.allclose(add, x + 2)
    assert jnp.allclose(sub, x - 2)
    assert jnp.allclose(mul, x * 2)
    assert jnp.allclose(div, x / 2)
    assert cmp.dtype == jnp.bool_
    assert jnp.array_equal(cmp, x > 1)

    # Also exercise the tiled (grid) path with a larger, non-tile-aligned size.
    y = jax.random.normal(jax.random.PRNGKey(1), (3, 7, 61, 53), dtype=jnp.float32)
    a2, s2, m2, d2, c2 = pt_module_forward(y)
    jax.block_until_ready((a2, s2, m2, d2, c2))
    assert jnp.allclose(a2, y + 2)
    assert jnp.allclose(s2, y - 2)
    assert jnp.allclose(m2, y * 2)
    assert jnp.allclose(d2, y / 2)
    assert jnp.array_equal(c2, y > 1)

    print("KERNEL_OK")
</pallas_src>

<mosaic_0001>
module attributes {stable_mosaic.version = 11 : i64} {
  func.func @_elementwise_kernel(%arg0: memref<16x128xf32, #tpu.memory_space<vmem>>, %arg1: memref<16x128xf32, #tpu.memory_space<vmem>>, %arg2: memref<16x128xf32, #tpu.memory_space<vmem>>, %arg3: memref<16x128xf32, #tpu.memory_space<vmem>>, %arg4: memref<16x128xf32, #tpu.memory_space<vmem>>, %arg5: memref<16x128xi32, #tpu.memory_space<vmem>>) attributes {dimension_semantics = [], scalar_prefetch = 0 : i64, scratch_operands = 0 : i64, tpu.core_type = #tpu.core_type<tc>} {
    %c0 = arith.constant 0 : index
    %c0_0 = arith.constant 0 : index
    %0 = vector.load %arg0[%c0, %c0_0] : memref<16x128xf32, #tpu.memory_space<vmem>>, vector<16x128xf32>
    %cst = arith.constant 2.000000e+00 : f32
    %1 = vector.broadcast %cst : f32 to vector<16x128xf32>
    %2 = arith.addf %0, %1 : vector<16x128xf32>
    %c0_1 = arith.constant 0 : index
    %c0_2 = arith.constant 0 : index
    %3 = vector.load %arg1[%c0_1, %c0_2] : memref<16x128xf32, #tpu.memory_space<vmem>>, vector<16x128xf32>
    tpu.vector_store %arg1[%c0_1, %c0_2], %2 {strides = array<i32>} : memref<16x128xf32, #tpu.memory_space<vmem>>, vector<16x128xf32>,
    %cst_3 = arith.constant 2.000000e+00 : f32
    %4 = vector.broadcast %cst_3 : f32 to vector<16x128xf32>
    %5 = arith.subf %0, %4 : vector<16x128xf32>
    %c0_4 = arith.constant 0 : index
    %c0_5 = arith.constant 0 : index
    %6 = vector.load %arg2[%c0_4, %c0_5] : memref<16x128xf32, #tpu.memory_space<vmem>>, vector<16x128xf32>
    tpu.vector_store %arg2[%c0_4, %c0_5], %5 {strides = array<i32>} : memref<16x128xf32, #tpu.memory_space<vmem>>, vector<16x128xf32>,
    %cst_6 = arith.constant 2.000000e+00 : f32
    %7 = vector.broadcast %cst_6 : f32 to vector<16x128xf32>
    %8 = arith.mulf %0, %7 : vector<16x128xf32>
    %c0_7 = arith.constant 0 : index
    %c0_8 = arith.constant 0 : index
    %9 = vector.load %arg3[%c0_7, %c0_8] : memref<16x128xf32, #tpu.memory_space<vmem>>, vector<16x128xf32>
    tpu.vector_store %arg3[%c0_7, %c0_8], %8 {strides = array<i32>} : memref<16x128xf32, #tpu.memory_space<vmem>>, vector<16x128xf32>,
    %cst_9 = arith.constant 5.000000e-01 : f32
    %10 = vector.broadcast %cst_9 : f32 to vector<16x128xf32>
    %11 = arith.mulf %0, %10 : vector<16x128xf32>
    %c0_10 = arith.constant 0 : index
    %c0_11 = arith.constant 0 : index
    %12 = vector.load %arg4[%c0_10, %c0_11] : memref<16x128xf32, #tpu.memory_space<vmem>>, vector<16x128xf32>
    tpu.vector_store %arg4[%c0_10, %c0_11], %11 {strides = array<i32>} : memref<16x128xf32, #tpu.memory_space<vmem>>, vector<16x128xf32>,
    %cst_12 = arith.constant 1.000000e+00 : f32
    %13 = vector.broadcast %cst_12 : f32 to vector<16x128xf32>
    %14 = arith.cmpf ogt, %0, %13 : vector<16x128xf32>
    %c0_13 = arith.constant 0 : index
    %c0_14 = arith.constant 0 : index
    %15 = vector.load %arg5[%c0_13, %c0_14] : memref<16x128xi32, #tpu.memory_space<vmem>>, vector<16x128xi32>
    %16 = arith.extui %14 : vector<16x128xi1> to vector<16x128xi32>
    %cst_15 = arith.constant dense<0> : vector<16x128xi32>
    %17 = arith.cmpi ne, %15, %cst_15 : vector<16x128xi32>
    tpu.vector_store %arg5[%c0_13, %c0_14], %16 {strides = array<i32>} : memref<16x128xi32, #tpu.memory_space<vmem>>, vector<16x128xi32>,
    return
  }
}

</mosaic_0001>

<bundles_post_ra>
// kernel: tpu_custom_call.1
= control target key start
LH: loop header
LB: loop body
LE: loop exit
PB: predicated region body
PF: predicated region fallthrough
CT: control target
= control target key end

     0   :  { %11 = vsyncpa [#allocation3], 0  ;;  %s399_s0 = inlined_call_operand.hbm [shape: f32[16,128], index: 0, kind: input, shape index: {}]   ;;  %s400_s1 = inlined_call_operand.hbm [shape: f32[16,128], index: 1, kind: output, shape index: {0}]   ;;  %s401_s2 = inlined_call_operand.hbm [shape: f32[16,128], index: 2, kind: output, shape index: {1}]   ;;  %s402_s3 = inlined_call_operand.hbm [shape: f32[16,128], index: 3, kind: output, shape index: {2}]   ;;  %s403_s4 = inlined_call_operand.hbm [shape: f32[16,128], index: 4, kind: output, shape index: {3}]   ;;  %s404_s5 = inlined_call_operand.vmem [shape: s32[16,128], index: 5, kind: output, shape index: {4}]  }
   0x1   :  { %12 = vsyncpa [#allocation4], 0 }
   0x2   :  { %13 = vsyncpa [#allocation7], 0 }
   0x3   :  { %14 = vsyncpa [#allocation10], 0  ;;  %s250_s18 = smov [#allocation2]   ;;  %s132_s22 = scalar_lea.hbm %s399_s0, 256 }
   0x4   :  { %s20_s19 = sshll.u32 %s250_s18, 4  ;;  %p133_p0 = scmp.ne.s32.totalorder %s399_s0, %s132_s22  ;;  %s21_s19 = int_to_ptr.vmem [resolvable:$true] %s20_s19 }
   0x5   :  { %p136_p1 = scmp.lt.u32.totalorder %s132_s22, %s399_s0 }
   0x7   :  { %p138_p2 = pnand %p136_p1, %p133_p0 }
   0x9   :  { %141 = shalt.err (!%p138_p2)
}
   0xa   :  { %s142_s27 = scalar_lea.vmem %s21_s19, 256  ;;  %p147_p4 = scmp.lt.s32.totalorder %s21_s19, %s21_s19 }
   0xb   :  { %p143_p3 = scmp.ne.s32.totalorder %s21_s19, %s142_s27  ;;  %p148_p5 = scmp.lt.s32.totalorder %s142_s27, %s142_s27 }
   0xd   :  { %p149_p6 = por %p148_p5, %p147_p4 }
   0xf   :  { %p150_p7 = pnand %p149_p6, %p143_p3 }
  0x11   :  { %153 = shalt.err (!%p150_p7)
}
  0x12   :  { %s251_s28 = smov 128   ;;  %s252_s29 = smov 8  }
  0x13   :  { %26 = dma.hbm_to_vmem [thread:$0]  %s399_s0, 256, %s21_s19, [#allocation3], %s251_s28, %s251_s28, %s252_s29  }
  0x14   :  { %242 = dma.done.wait [#allocation3], 256  }
  0x15   :  { %243 = vsyncadd [#allocation3], 4294967040  ;;  %s253_s7 = smov [#allocation6]   ;;  %s254_s9 = smov [#allocation5]   ;;  %v30_v0 = vld [vmem:[#allocation2] sm:$0xff]  ;;  %v31_v1 = vld [vmem:[#allocation2 + $0x8] sm:$0xff] }
  0x16   :  { %s71_s8 = sshll.u32 %s253_s7, 4  ;;  %s59_s10 = sshll.u32 %s254_s9, 4  ;;  %v122_v2 = vadd.f32 -2.0, %v30_v0  ;;  %v123_v3 = vadd.f32 -2.0, %v31_v1  ;;  %v32_v4 = vadd.f32 2.0, %v30_v0  ;;  %v33_v5 = vadd.f32 2.0, %v31_v1  ;;  %s303_s8 = int_to_ptr.vmem [resolvable:$true] %s71_s8  ;;  %s305_s10 = int_to_ptr.vmem [resolvable:$true] %s59_s10 }
  0x17   :  { %s255_s11 = smov [#allocation8]   ;;  %s256_s13 = smov [#allocation9]   ;;  %v40_v6 = vmul.f32 2.0, %v30_v0  ;;  %v41_v7 = vmul.f32 2.0, %v31_v1  ;;  %v44_v8 = vmul.f32 0.5, %v30_v0  ;;  %v45_v9 = vmul.f32 0.5, %v31_v1 }
  0x18   :  { %s83_s12 = sshll.u32 %s255_s11, 4  ;;  %s95_s14 = sshll.u32 %s256_s13, 4  ;;  %38 = vst [vmem:[#allocation6] sm:$0xff] %v122_v2  ;;  %39 = vst [vmem:[#allocation6 + $0x8] sm:$0xff] %v123_v3  ;;  %vm48_vm0 = vcmp.gt.f32.partialorder %v30_v0, 1.0  ;;  %vm49_vm1 = vcmp.gt.f32.partialorder %v31_v1, 1.0  ;;  %s307_s12 = int_to_ptr.vmem [resolvable:$true] %s83_s12  ;;  %s309_s14 = int_to_ptr.vmem [resolvable:$true] %s95_s14 }
  0x19   :  { %34 = vst [vmem:[#allocation5] sm:$0xff] %v32_v4  ;;  %35 = vst [vmem:[#allocation5 + $0x8] sm:$0xff] %v33_v5  ;;  %s154_s0 = scalar_lea.vmem %s303_s8, 256  ;;  %p159_p9 = scmp.lt.s32.totalorder %s303_s8, %s303_s8 }
  0x1a   :  { %42 = vst [vmem:[#allocation8] sm:$0xff] %v40_v6  ;;  %43 = vst [vmem:[#allocation8 + $0x8] sm:$0xff] %v41_v7  ;;  %p155_p8 = scmp.ne.s32.totalorder %s303_s8, %s154_s0  ;;  %p160_p10 = scmp.lt.s32.totalorder %s154_s0, %s154_s0 }
  0x1b   :  { %46 = vst [vmem:[#allocation9] sm:$0xff] %v44_v8  ;;  %47 = vst [vmem:[#allocation9 + $0x8] sm:$0xff] %v45_v9 }
  0x1c   :  { %p161_p11 = por %p160_p10, %p159_p9 }
  0x1e   :  { %p162_p12 = pnand %p161_p11, %p155_p8 }
  0x20   :  { %165 = shalt.err (!%p162_p12)
}
  0x21   :  { %s166_s17 = scalar_lea.hbm %s401_s2, 256 }
  0x22   :  { %p167_p13 = scmp.ne.s32.totalorder %s401_s2, %s166_s17  ;;  %p170_p0 = scmp.lt.u32.totalorder %s166_s17, %s401_s2 }
  0x24   :  { %p172_p1 = pnand %p170_p0, %p167_p13 }
  0x26   :  { %175 = shalt.err (!%p172_p1)
}
  0x27   :  { %77 = dma.vmem_to_hbm [thread:$0]  %s303_s8, 256, %s401_s2, [#allocation7], %s251_s28, %s251_s28, %s252_s29   ;;  %v257_v10 = vmov 0  }
  0x28   :  { %v50_v11 = vsel %vm48_vm0, 1, %v257_v10  ;;  %v51_v12 = vsel %vm49_vm1, 1, %v257_v10  ;;  %s176_s30 = scalar_lea.vmem %s305_s10, 256  ;;  %p181_p3 = scmp.lt.s32.totalorder %s305_s10, %s305_s10 }
  0x29   :  { %52 = vst [vmem:[%s404_s5] sm:$0xff] %v50_v11  ;;  %53 = vst [vmem:[%s404_s5 + $0x8] sm:$0xff] %v51_v12  ;;  %p177_p2 = scmp.ne.s32.totalorder %s305_s10, %s176_s30  ;;  %p182_p4 = scmp.lt.s32.totalorder %s176_s30, %s176_s30 }
  0x2b   :  { %p183_p5 = por %p182_p4, %p181_p3 }
  0x2d   :  { %p184_p6 = pnand %p183_p5, %p177_p2 }
  0x2f   :  { %187 = shalt.err (!%p184_p6)
}
  0x30   :  { %s188_s7 = scalar_lea.hbm %s400_s1, 256 }
  0x31   :  { %p189_p7 = scmp.ne.s32.totalorder %s400_s1, %s188_s7  ;;  %p192_p8 = scmp.lt.u32.totalorder %s188_s7, %s400_s1 }
  0x33   :  { %p194_p9 = pnand %p192_p8, %p189_p7 }
  0x35   :  { %197 = shalt.err (!%p194_p9)
}
  0x36   :  { %65 = dma.vmem_to_hbm [thread:$0]  %s305_s10, 256, %s400_s1, [#allocation4], %s251_s28, %s251_s28, %s252_s29  }
  0x37   :  { %s198_s15 = scalar_lea.vmem %s307_s12, 256  ;;  %p203_p11 = scmp.lt.s32.totalorder %s307_s12, %s307_s12 }
  0x38   :  { %p199_p10 = scmp.ne.s32.totalorder %s307_s12, %s198_s15  ;;  %p204_p12 = scmp.lt.s32.totalorder %s198_s15, %s198_s15 }
  0x3a   :  { %p205_p13 = por %p204_p12, %p203_p11 }
  0x3c   :  { %p206_p0 = pnand %p205_p13, %p199_p10 }
  0x3e   :  { %209 = shalt.err (!%p206_p0)
}
  0x3f   :  { %s210_s18 = scalar_lea.hbm %s402_s3, 256 }
  0x40   :  { %p211_p1 = scmp.ne.s32.totalorder %s402_s3, %s210_s18  ;;  %p214_p2 = scmp.lt.u32.totalorder %s210_s18, %s402_s3 }
  0x42   :  { %p216_p3 = pnand %p214_p2, %p211_p1 }
  0x44   :  { %219 = shalt.err (!%p216_p3)
}
  0x45   :  { %89 = dma.vmem_to_hbm [thread:$0]  %s307_s12, 256, %s402_s3, [#allocation7], %s251_s28, %s251_s28, %s252_s29  }
  0x46   :  { %s220_s23 = scalar_lea.vmem %s309_s14, 256  ;;  %p225_p5 = scmp.lt.s32.totalorder %s309_s14, %s309_s14 }
  0x47   :  { %p221_p4 = scmp.ne.s32.totalorder %s309_s14, %s220_s23  ;;  %p226_p6 = scmp.lt.s32.totalorder %s220_s23, %s220_s23 }
  0x49   :  { %p227_p7 = por %p226_p6, %p225_p5 }
  0x4b   :  { %p228_p8 = pnand %p227_p7, %p221_p4 }
  0x4d   :  { %231 = shalt.err (!%p228_p8)
}
  0x4e   :  { %s232_s26 = scalar_lea.hbm %s403_s4, 256 }
  0x4f   :  { %p233_p9 = scmp.ne.s32.totalorder %s403_s4, %s232_s26  ;;  %p236_p10 = scmp.lt.u32.totalorder %s232_s26, %s403_s4 }
  0x51   :  { %p238_p11 = pnand %p236_p10, %p233_p9 }
  0x53   :  { %241 = shalt.err (!%p238_p11)
}
  0x54   :  { %101 = dma.vmem_to_hbm [thread:$0]  %s309_s14, 256, %s403_s4, [#allocation10], %s251_s28, %s251_s28, %s252_s29  }
  0x55   :  { %244 = dma.done.wait [#allocation4], 256  }
  0x56   :  { %245 = vsyncadd [#allocation4], 4294967040 }
  0x57   :  { %246 = dma.done.wait [#allocation7], 512  }
  0x58   :  { %247 = vsyncadd [#allocation7], 4294966784 }
  0x59   :  { %248 = dma.done.wait [#allocation10], 256  }
  0x5a   :  { %249 = vsyncadd [#allocation10], 4294967040 }
  0x5b   :  { %118 = vsyncpa [#allocation3], 1 }
  0x5c   :  { %119 = vsyncpa [#allocation4], 1 }
  0x5d   :  { %120 = vsyncpa [#allocation7], 1 }
  0x5e   :  { %121 = vsyncpa [#allocation10], 1 }

</bundles_post_ra>
